<compile_context>
chip_gen: v6e
topology: v6e:2x2x1
jax: 0.10.0
libtpu: 0.0.40
codegen_flags: <defaults>
</compile_context>

<pallas_src>
import functools

import jax
import jax.numpy as jnp
from jax.experimental import pallas as pl
from jax.experimental.pallas import tpu as pltpu


def _round_up(x, m):
    return ((x + m - 1) // m) * m


def _round_down(x, m):
    return (x // m) * m


def _choose_tm(B, F, C, block_rows, in_itemsize, out_itemsize,
               vmem_budget_bytes=24 * 1024 * 1024):
    """Pick the batch tile size: >=2 tiles once B > 8, multiple of 8, VMEM-safe."""
    if B <= 8:
        return B  # single full-extent tile; problem is tiny, nothing to pipeline
    # At least 2 row tiles so input prefetch / MXU / output writeback overlap
    # and v7x's two TensorCores both get work.
    tm = min(block_rows, _round_up(pl.cdiv(B, 2), 8))
    # VMEM guard (double-buffered x & y tiles + double-buffered weight/bias).
    resident = 2 * (F * C * 2 + C * 4)                      # bf16 weight + f32 bias
    per_row = 2 * (F * in_itemsize + C * out_itemsize)      # x tile + y tile
    max_tm = _round_down(max(8, (vmem_budget_bytes - resident) // per_row), 8)
    return max(8, min(tm, max_tm))


def _linear_kernel(x_ref, w_ref, b_ref, o_ref, *, compute_dtype):
    # x_ref: (tm, F)   w_ref: (F, C) pre-transposed, pre-cast bf16
    # b_ref: (1, C) f32   o_ref: (tm, C)
    x = x_ref[...].astype(compute_dtype)
    acc = jnp.dot(x, w_ref[...], preferred_element_type=jnp.float32)
    o_ref[...] = (acc + b_ref[...]).astype(o_ref.dtype)


def action_classifier_forward(x, weight, bias, *, block_rows=1024,
                              use_bf16=True, out_dtype=None):
    """y = x @ weight.T + bias   (PyTorch nn.Linear semantics).

    x:      (B, F)  float32
    weight: (C, F)  float32   (PyTorch layout: [out_features, in_features])
    bias:   (C,)    float32
    returns (B, C) in `out_dtype` (default: x.dtype)
    """
    B, F = x.shape
    C = weight.shape[0]
    out_dtype = x.dtype if out_dtype is None else out_dtype
    compute_dtype = jnp.bfloat16 if use_bf16 else x.dtype

    # One-time wrapper-side transpose + cast: (C, F) f32 -> (F, C) bf16.
    # This lets the MXU consume the RHS with K on the sublane dim directly and
    # halves the (VMEM-resident) weight's DMA bytes.
    w_t = weight.T.astype(compute_dtype)                 # (F, C)
    b2 = bias.reshape(1, C).astype(jnp.float32)          # (1, C)

    in_itemsize = jnp.dtype(x.dtype).itemsize
    out_itemsize = jnp.dtype(out_dtype).itemsize
    tm = _choose_tm(B, F, C, block_rows, in_itemsize, out_itemsize)
    grid = (pl.cdiv(B, tm),)  # ragged tail handled by masked partial block

    cost = pl.CostEstimate(
        flops=2 * B * F * C,
        transcendentals=0,
        bytes_accessed=(B * F * in_itemsize            # x read
                        + F * C * 2                    # bf16 weight read
                        + C * 4                        # bias read
                        + B * C * out_itemsize),       # y write
    )

    # Note: weight/bias blocks are constant-index and tiny here; for large F,
    # single-buffer them (pipeline_mode) or stage through a run_scoped buffer.
    y = pl.pallas_call(
        functools.partial(_linear_kernel, compute_dtype=compute_dtype),
        out_shape=jax.ShapeDtypeStruct((B, C), out_dtype),
        grid=grid,
        in_specs=[
            pl.BlockSpec((tm, F), lambda i: (i, 0)),   # x: tiled over batch rows
            pl.BlockSpec((F, C), lambda i: (0, 0)),    # weight: VMEM-resident
            pl.BlockSpec((1, C), lambda i: (0, 0)),    # bias: VMEM-resident
        ],
        out_specs=pl.BlockSpec((tm, C), lambda i: (i, 0)),
        compiler_params=pltpu.CompilerParams(
            dimension_semantics=("parallel",),  # batch tiles -> both TCs on v7x
        ),
        cost_estimate=cost,
    )(x, w_t, b2)

    return y


if __name__ == "__main__":
    # Small shapes implied by the module: feature_dim=32, num_classes=8, batch=2.
    B, FEATURE_DIM, NUM_CLASSES = 2, 32, 8

    key = jax.random.PRNGKey(0)
    kx, kw, kb = jax.random.split(key, 3)

    # Deterministic init (mimics nn.Linear's uniform(-1/sqrt(F), 1/sqrt(F))).
    bound = 1.0 / jnp.sqrt(jnp.float32(FEATURE_DIM))
    x = jax.random.normal(kx, (B, FEATURE_DIM), dtype=jnp.float32)
    weight = jax.random.uniform(
        kw, (NUM_CLASSES, FEATURE_DIM), minval=-bound, maxval=bound, dtype=jnp.float32
    )
    bias = jax.random.uniform(
        kb, (NUM_CLASSES,), minval=-bound, maxval=bound, dtype=jnp.float32
    )

    # Tiny-batch path (single full-extent tile).
    y = jax.block_until_ready(action_classifier_forward(x, weight, bias))
    y_ref = x @ weight.T + bias
    assert y.shape == (B, NUM_CLASSES)
    assert jnp.allclose(y, y_ref, atol=3e-2, rtol=3e-2)

    # Multi-tile + ragged-tail path (B not a multiple of tm): exercises the
    # pipelined grid and the masked partial output block.
    B2 = 100
    x2 = jax.random.normal(jax.random.PRNGKey(1), (B2, FEATURE_DIM), dtype=jnp.float32)
    y2 = jax.block_until_ready(action_classifier_forward(x2, weight, bias))
    y2_ref = x2 @ weight.T + bias
    assert y2.shape == (B2, NUM_CLASSES)
    assert jnp.allclose(y2, y2_ref, atol=3e-2, rtol=3e-2)

    print("KERNEL_OK")
</pallas_src>

<mosaic_0001>
module attributes {stable_mosaic.version = 11 : i64} {
  func.func @_linear_kernel(%arg0: i32, %arg1: memref<2x32xf32, #tpu.memory_space<vmem>>, %arg2: memref<32x8xbf16, #tpu.memory_space<vmem>>, %arg3: memref<1x8xf32, #tpu.memory_space<vmem>>, %arg4: memref<2x8xf32, #tpu.memory_space<vmem>>) attributes {dimension_semantics = [#tpu.dimension_semantics<parallel>], iteration_bounds = array<i64: 1>, scalar_prefetch = 0 : i64, scratch_operands = 0 : i64, tpu.core_type = #tpu.core_type<tc>, window_params = [{transform_indices = @transform_0, window_bounds = array<i64: 2, 32>}, {pipeline_mode = #tpu.pipeline_mode<synchronous>, transform_indices = @transform_1, window_bounds = array<i64: 32, 8>}, {pipeline_mode = #tpu.pipeline_mode<synchronous>, transform_indices = @transform_2, window_bounds = array<i64: 1, 8>}, {transform_indices = @transform_3, window_bounds = array<i64: 2, 8>}]} {
    %c0 = arith.constant 0 : index
    %c0_0 = arith.constant 0 : index
    %0 = vector.load %arg1[%c0, %c0_0] : memref<2x32xf32, #tpu.memory_space<vmem>>, vector<2x32xf32>
    %1 = arith.truncf %0 : vector<2x32xf32> to vector<2x32xbf16>
    %c0_1 = arith.constant 0 : index
    %c0_2 = arith.constant 0 : index
    %2 = vector.load %arg2[%c0_1, %c0_2] : memref<32x8xbf16, #tpu.memory_space<vmem>>, vector<32x8xbf16>
    %cst = arith.constant dense<0.000000e+00> : vector<2x8xf32>
    %3 = tpu.matmul %1, %2, %cst {dimension_numbers = #tpu.dot_dimension_numbers<[1], [0], [0], [1], [0, 0, 1, 1], [], []>} : vector<2x32xbf16>, vector<32x8xbf16>, vector<2x8xf32> -> vector<2x8xf32>
    %c0_3 = arith.constant 0 : index
    %c0_4 = arith.constant 0 : index
    %4 = vector.load %arg3[%c0_3, %c0_4] : memref<1x8xf32, #tpu.memory_space<vmem>>, vector<1x8xf32>
    %5 = vector.broadcast %4 : vector<1x8xf32> to vector<2x8xf32>
    %6 = arith.addf %3, %5 : vector<2x8xf32>
    %c0_5 = arith.constant 0 : index
    %c0_6 = arith.constant 0 : index
    %7 = vector.load %arg4[%c0_5, %c0_6] : memref<2x8xf32, #tpu.memory_space<vmem>>, vector<2x8xf32>
    tpu.vector_store %arg4[%c0_5, %c0_6], %6 {strides = array<i32>} : memref<2x8xf32, #tpu.memory_space<vmem>>, vector<2x8xf32>,
    return
  }
  func.func @transform_0(%arg0: i32) -> (i32, i32) {
    %c0_i32 = arith.constant 0 : i32
    %c0_i32_0 = arith.constant 0 : i32
    return %arg0, %c0_i32 : i32, i32
  }
  func.func @transform_1(%arg0: i32) -> (i32, i32) {
    %c0_i32 = arith.constant 0 : i32
    %c0_i32_0 = arith.constant 0 : i32
    %c0_i32_1 = arith.constant 0 : i32
    return %c0_i32, %c0_i32_0 : i32, i32
  }
  func.func @transform_2(%arg0: i32) -> (i32, i32) {
    %c0_i32 = arith.constant 0 : i32
    %c0_i32_0 = arith.constant 0 : i32
    %c0_i32_1 = arith.constant 0 : i32
    return %c0_i32, %c0_i32_0 : i32, i32
  }
  func.func @transform_3(%arg0: i32) -> (i32, i32) {
    %c0_i32 = arith.constant 0 : i32
    %c0_i32_0 = arith.constant 0 : i32
    return %arg0, %c0_i32 : i32, i32
  }
}

</mosaic_0001>

<bundles_post_ra>
// kernel: tpu_custom_call.1
= control target key start
LH: loop header
LB: loop body
LE: loop exit
PB: predicated region body
PF: predicated region fallthrough
CT: control target
= control target key end

     0   :  { %v143_v1 = vmov 0.0   ;;  %vm144_vm0 = vmmov 0   ;;  %s181_s0 = inlined_call_operand.vmem [shape: f32[2,32], index: 0, kind: input, shape index: {}]   ;;  %s182_s1 = inlined_call_operand.vmem [shape: bf16[32,8], index: 1, kind: input, shape index: {}]   ;;  %s183_s2 = inlined_call_operand.vmem [shape: f32[1,8], index: 2, kind: input, shape index: {}]   ;;  %s184_s3 = inlined_call_operand.hbm [shape: f32[2,8], index: 3, kind: output, shape index: {}]  }
   0x1   :  { %v119_v0 = vld [vmem:[%s182_s1 + $0x8] sm:$0xff]   ;;  %108 = vmatprep.subr.bf16.mxu0 %v143_v1  ;;  %v120_v2 = vld [vmem:[%s182_s1] sm:$0xff]   ;;  %112 = vmatprep.mubr.msk.bf16.mxu0 %vm144_vm0, %v143_v1 }
   0x2   :  { %109 = vmatpush3.bf16.msra.mxu0 %v119_v0  ;;  %v16_v3 = vld [vmem:[%s181_s0] sm:$0x3] }
   0x3   :  { %110 = vmatprep.subr.bf16.mxu0 %v143_v1 }
   0x4   :  { %8 = vsyncpa [#allocation3], 0  ;;  %v17_v4 = vpack.c.bf16 %v16_v3, %v16_v3  ;;  %vm41_vm1 = vcmask 261120   ;;  %v101_v5 = vld [vmem:[%s183_s2] ss:$0 sm:$0xff]  ;;  %s145_s20 = smov [#allocation2]  }
   0x5   :  { %s93_s21 = sshll.u32 %s145_s20, 4  ;;  %vm85_vm2 = vcmask 58368   ;;  %s94_s21 = int_to_ptr.vmem [resolvable:$true] %s93_s21 }
   0x6   :  { %111 = vmatpush3.bf16.msra.mxu0 %v120_v2  ;;  %s121_s0 = scalar_lea.vmem %s94_s21, 32  ;;  %p126_p1 = scmp.lt.s32.totalorder %s94_s21, %s94_s21 }
   0x7   :  { %p122_p0 = scmp.ne.s32.totalorder %s94_s21, %s121_s0  ;;  %p127_p2 = scmp.lt.s32.totalorder %s121_s0, %s121_s0 }
   0x9   :  { %113 = vmatmul.mubr.msk.bf16.vlgmr.msra.gmra.mxu0 %vm41_vm1, %v17_v4  ;;  %p128_p3 = por %p127_p2, %p126_p1 }
   0xb   :  { %p129_p4 = pnand %p128_p3, %p122_p0 }
  0xc9   :  { %v79_v6 = vpop.f32.mrf.mxu0 }
  0xca   :  { %v80_v7 = vadd.f32 %v101_v5, %v79_v6 }
  0xcb   :  { %v114_v8 = vpop.f32.mrf.mxu0 }
  0xcc   :  { %86 = vst.msk [vmem:[#allocation2] sm:$0x3] %vm85_vm2, %v80_v7 }
  0xcd   :  { %v82_v9 = vpop.f32.mrf.mxu0 }
  0xce   :  { %132 = shalt.err (!%p129_p4)
}
  0xcf   :  { %96 = dma.vmem_to_hbm [thread:$0]  %s94_s21, 32, %s184_s3, [#allocation3]   ;;  %v115_v10 = vpop.f32.mrf.mxu0 }
  0xd0   :  { %141 = dma.done.wait [#allocation3], 32  }
  0xd1   :  { %142 = vsyncadd [#allocation3], 4294967264 }
  0xd2   :  { %100 = vsyncpa [#allocation3], 1 }

</bundles_post_ra>
